<compile_context>
chip_gen: v7x
topology: tpu7x:2x2x1
jax: 0.10.0
libtpu: 0.0.40
codegen_flags: <defaults>
</compile_context>

<pallas_src>
import numpy as np
import jax
import jax.numpy as jnp
from jax.experimental import pallas as pl
from jax.experimental.pallas import tpu as pltpu

N_QUBITS = 4
N_LAYERS = 2
BATCH = 2
DIM = 2 ** N_QUBITS          # 16
DIM2 = 2 * DIM               # stacked [re | im] lane width


def tfq_kernel(s0_ref, mats_ref, cs_ref, out_ref):
    # s0_ref  : (B, 2D)           stacked state after (static layer 0 + CZ) on |0..0>
    # mats_ref: (n+L+1, 2D, 2D)   [0..n-1]  signed permutations (bit-flip on wire q
    #                                        + re/im swap, i.e. -i·X_q),
    #                             [n..n+L-1] static rotation layers 1..L (CZ folded
    #                                        into all but the last),
    #                             [n+L]      PauliZ sign matrix, zero-padded to 2D cols
    # cs_ref  : (L*n, 2B, 2D)     rows [:B] = cos, rows [B:] = sin of encoding
    #                             half-angles, pre-broadcast over the lane dim
    B = s0_ref.shape[0]
    s = s0_ref[...]                                            # (B, 2D)
    qm = [mats_ref[q] for q in range(N_QUBITS)]                # hoisted gate matrices
    for l in range(N_LAYERS):
        # Batch-dependent RX encoding, one gate per wire:
        #   new = cos * s + sin * (s @ Q_q)
        # (RX has a=d=cos, b=c=-i·sin, so no basis-dependent select is needed;
        #  Q_q applies the bit-flip and the re<->im swap with the -1 sign built in.)
        for q in range(N_QUBITS):
            cl = cs_ref[l * N_QUBITS + q]                      # (2B, 2D)
            t = jnp.dot(s, qm[q], preferred_element_type=jnp.float32)
            s = cl[:B] * s + cl[B:] * t
        # Next static rotation layer (+ CZ chain, except after the final layer):
        s = jnp.dot(s, mats_ref[N_QUBITS + l],
                    preferred_element_type=jnp.float32)
    # Measurement: <Z_q> = sum_i (re_i^2 + im_i^2) * (1 - 2*bit_q(i))
    meas = jnp.dot(s * s, mats_ref[N_QUBITS + N_LAYERS],
                   preferred_element_type=jnp.float32)         # (B, 2D), cols>=n are 0
    out_ref[...] = meas[:, :N_QUBITS]


@jax.jit
def tfq_forward(inputs, params, input_params):
    """inputs: (B, n_qubits); params: (n_layers+1, n_qubits, 3);
    input_params: (n_layers, n_qubits, 1). Returns (B, n_qubits) PauliZ expvals."""
    x = inputs.astype(jnp.float32)
    params = params.astype(jnp.float32)
    inp = input_params.reshape(N_LAYERS, N_QUBITS).astype(jnp.float32)
    B = x.shape[0]

    # ---------- host-built constants (parameter independent) ----------
    idx = np.arange(DIM)
    bits = np.stack([(idx >> (N_QUBITS - 1 - q)) & 1
                     for q in range(N_QUBITS)]).astype(np.float32)   # (n, D)
    cz_diag = np.ones(DIM, np.float32)
    for w in range(N_QUBITS - 1):                                     # CZ chain
        cz_diag *= 1.0 - 2.0 * bits[w] * bits[w + 1]
    # Signed permutations: output col j<D picks im[j^mask]; col D+j picks -re[j^mask].
    qmats = np.zeros((N_QUBITS, DIM2, DIM2), np.float32)
    for q in range(N_QUBITS):
        mask = 1 << (N_QUBITS - 1 - q)
        for j in range(DIM):
            qmats[q, DIM + (j ^ mask), j] = 1.0
            qmats[q, j ^ mask, DIM + j] = -1.0
    zcol = (1.0 - 2.0 * bits).T                                       # (D, n)
    zpad = np.zeros((DIM2, DIM2), np.float32)                         # Z padded to 2D cols
    zpad[:DIM, :N_QUBITS] = zcol
    zpad[DIM:, :N_QUBITS] = zcol

    # ---------- compose static rotation layers (wrapper-side, trivial XLA) ----------
    half = 0.5 * params
    cosp = jnp.cos(half).astype(jnp.complex64)
    sinp = jnp.sin(half).astype(jnp.complex64)
    zc = jnp.zeros((), jnp.complex64)

    def block_real(U):
        # Row-vector convention: s_row' = s_row @ U.T ; embed complex matmul as a
        # real (2D,2D) block matrix acting on lane-stacked [re | im].
        M = U.T
        Wr = jnp.real(M).astype(jnp.float32)
        Wi = jnp.imag(M).astype(jnp.float32)
        return jnp.concatenate(
            [jnp.concatenate([Wr, Wi], axis=1),
             jnp.concatenate([-Wi, Wr], axis=1)], axis=0)             # (2D, 2D)

    w_blocks = []
    for l in range(N_LAYERS + 1):
        U = jnp.ones((1, 1), jnp.complex64)
        for q in range(N_QUBITS):                 # wire 0 = most significant bit
            cx, cy, cz_ = cosp[l, q, 0], cosp[l, q, 1], cosp[l, q, 2]
            sx, sy, sz_ = sinp[l, q, 0], sinp[l, q, 1], sinp[l, q, 2]
            rx = jnp.stack([jnp.stack([cx, -1j * sx]),
                            jnp.stack([-1j * sx, cx])])
            ry = jnp.stack([jnp.stack([cy, -sy]),
                            jnp.stack([sy, cy])])
            rz = jnp.stack([jnp.stack([cz_ - 1j * sz_, zc]),
                            jnp.stack([zc, cz_ + 1j * sz_])])
            U = jnp.kron(U, rz @ ry @ rx)
        if l < N_LAYERS:                          # fold CZ-chain diagonal into the layer
            U = jnp.asarray(cz_diag)[:, None] * U
        w_blocks.append(block_real(U))

    # Layer 0 applied to |0...0> == row 0 of its block matrix -> fold into init state.
    s0 = jnp.tile(w_blocks[0][0:1, :], (B, 1))                        # (B, 2D)
    w_stack = jnp.stack(w_blocks[1:], axis=0)                         # (L, 2D, 2D)

    # One packed matrix slab: [Q_0..Q_{n-1}, W_1..W_L, Z_padded] -> single DMA.
    mats = jnp.concatenate(
        [jnp.asarray(qmats), w_stack, jnp.asarray(zpad)[None]], axis=0)  # (n+L+1, 2D, 2D)

    # Batch-dependent encoding RX half-angle trig, computed in the wrapper and
    # pre-broadcast to full lane width so the kernel does plain elementwise muls.
    ang = 0.5 * inp[:, None, :] * x[None, :, :]                       # (L, B, n)
    trig = jnp.concatenate([jnp.cos(ang), jnp.sin(ang)], axis=1)      # (L, 2B, n)
    trig = jnp.transpose(trig, (0, 2, 1)).reshape(N_LAYERS * N_QUBITS, 2 * B, 1)
    cs = jnp.broadcast_to(trig, (N_LAYERS * N_QUBITS, 2 * B, DIM2))   # (L*n, 2B, 2D)

    vmem = pl.BlockSpec(memory_space=pltpu.MemorySpace.VMEM)
    return pl.pallas_call(
        tfq_kernel,
        out_shape=jax.ShapeDtypeStruct((B, N_QUBITS), jnp.float32),
        in_specs=[vmem] * 3,
        out_specs=vmem,
    )(s0, mats, cs)


def reference(x, params, input_params):
    """Pure numpy complex128 statevector reference (same gate conventions)."""
    n = N_QUBITS
    D = 2 ** n

    def op1(G, q):
        return np.kron(np.kron(np.eye(2 ** q), G), np.eye(2 ** (n - 1 - q)))

    def rx(t):
        c, s = np.cos(t / 2), np.sin(t / 2)
        return np.array([[c, -1j * s], [-1j * s, c]])

    def ry(t):
        c, s = np.cos(t / 2), np.sin(t / 2)
        return np.array([[c, -s], [s, c]], dtype=complex)

    def rz(t):
        return np.array([[np.exp(-1j * t / 2), 0], [0, np.exp(1j * t / 2)]])

    bits = np.array([[(i >> (n - 1 - q)) & 1 for i in range(D)] for q in range(n)])
    outs = []
    for b in range(x.shape[0]):
        st = np.zeros(D, dtype=np.complex128)
        st[0] = 1.0

        def rot_layer(st, l):
            for w in range(n):
                st = op1(rx(params[l, w, 0]), w) @ st
                st = op1(ry(params[l, w, 1]), w) @ st
                st = op1(rz(params[l, w, 2]), w) @ st
            return st

        for l in range(N_LAYERS):
            st = rot_layer(st, l)
            for w in range(n - 1):
                st = st * (1 - 2 * bits[w] * bits[w + 1])
            for w in range(n):
                st = op1(rx(input_params[l, w, 0] * x[b, w]), w) @ st
        st = rot_layer(st, N_LAYERS)
        probs = np.abs(st) ** 2
        outs.append([(probs * (1 - 2 * bits[q])).sum() for q in range(n)])
    return np.array(outs)


if __name__ == "__main__":
    key = jax.random.PRNGKey(0)
    k1, k2, k3 = jax.random.split(key, 3)
    # Deterministic "init_method" replacements: uniform weight / input inits.
    inputs = jax.random.uniform(k1, (BATCH, N_QUBITS), jnp.float32, -1.0, 1.0)
    params = jax.random.uniform(k2, (N_LAYERS + 1, N_QUBITS, 3), jnp.float32,
                                0.0, 2.0 * np.pi)
    input_params = jax.random.uniform(k3, (N_LAYERS, N_QUBITS, 1), jnp.float32,
                                      0.0, 1.0)

    out = tfq_forward(inputs, params, input_params)
    out = jax.block_until_ready(out)

    ref = reference(np.asarray(inputs, np.float64),
                    np.asarray(params, np.float64),
                    np.asarray(input_params, np.float64))
    np.testing.assert_allclose(np.asarray(out), ref, atol=1e-3, rtol=1e-3)
    print("KERNEL_OK")
</pallas_src>

<mosaic_0001>
module attributes {stable_mosaic.version = 11 : i64} {
  func.func @tfq_kernel(%arg0: memref<2x32xf32, #tpu.memory_space<vmem>>, %arg1: memref<7x32x32xf32, #tpu.memory_space<vmem>>, %arg2: memref<8x4x32xf32, #tpu.memory_space<vmem>>, %arg3: memref<2x4xf32, #tpu.memory_space<vmem>>) attributes {dimension_semantics = [], scalar_prefetch = 0 : i64, scratch_operands = 0 : i64, tpu.core_type = #tpu.core_type<tc>} {
    %c0 = arith.constant 0 : index
    %c0_0 = arith.constant 0 : index
    %0 = vector.load %arg0[%c0, %c0_0] : memref<2x32xf32, #tpu.memory_space<vmem>>, vector<2x32xf32>
    %c0_1 = arith.constant 0 : index
    %c0_2 = arith.constant 0 : index
    %c0_3 = arith.constant 0 : index
    %1 = vector.load %arg1[%c0_1, %c0_2, %c0_3] : memref<7x32x32xf32, #tpu.memory_space<vmem>>, vector<1x32x32xf32>
    %2 = vector.shape_cast %1 : vector<1x32x32xf32> to vector<32x32xf32>
    %c1 = arith.constant 1 : index
    %c0_4 = arith.constant 0 : index
    %c0_5 = arith.constant 0 : index
    %3 = vector.load %arg1[%c1, %c0_4, %c0_5] : memref<7x32x32xf32, #tpu.memory_space<vmem>>, vector<1x32x32xf32>
    %4 = vector.shape_cast %3 : vector<1x32x32xf32> to vector<32x32xf32>
    %c2 = arith.constant 2 : index
    %c0_6 = arith.constant 0 : index
    %c0_7 = arith.constant 0 : index
    %5 = vector.load %arg1[%c2, %c0_6, %c0_7] : memref<7x32x32xf32, #tpu.memory_space<vmem>>, vector<1x32x32xf32>
    %6 = vector.shape_cast %5 : vector<1x32x32xf32> to vector<32x32xf32>
    %c3 = arith.constant 3 : index
    %c0_8 = arith.constant 0 : index
    %c0_9 = arith.constant 0 : index
    %7 = vector.load %arg1[%c3, %c0_8, %c0_9] : memref<7x32x32xf32, #tpu.memory_space<vmem>>, vector<1x32x32xf32>
    %8 = vector.shape_cast %7 : vector<1x32x32xf32> to vector<32x32xf32>
    %c0_10 = arith.constant 0 : index
    %c0_11 = arith.constant 0 : index
    %c0_12 = arith.constant 0 : index
    %9 = vector.load %arg2[%c0_10, %c0_11, %c0_12] : memref<8x4x32xf32, #tpu.memory_space<vmem>>, vector<1x4x32xf32>
    %10 = vector.shape_cast %9 : vector<1x4x32xf32> to vector<4x32xf32>
    %cst = arith.constant dense<0.000000e+00> : vector<2x32xf32>
    %11 = tpu.matmul %0, %2, %cst {dimension_numbers = #tpu.dot_dimension_numbers<[1], [0], [0], [1], [0, 0, 1, 1], [], []>} : vector<2x32xf32>, vector<32x32xf32>, vector<2x32xf32> -> vector<2x32xf32>
    %12 = vector.extract_strided_slice %10 {offsets = [0, 0], sizes = [2, 32], strides = [1, 1]} : vector<4x32xf32> to vector<2x32xf32>
    %13 = arith.mulf %12, %0 : vector<2x32xf32>
    %14 = vector.extract_strided_slice %10 {offsets = [2, 0], sizes = [2, 32], strides = [1, 1]} : vector<4x32xf32> to vector<2x32xf32>
    %15 = arith.mulf %14, %11 : vector<2x32xf32>
    %16 = arith.addf %13, %15 : vector<2x32xf32>
    %c1_13 = arith.constant 1 : index
    %c0_14 = arith.constant 0 : index
    %c0_15 = arith.constant 0 : index
    %17 = vector.load %arg2[%c1_13, %c0_14, %c0_15] : memref<8x4x32xf32, #tpu.memory_space<vmem>>, vector<1x4x32xf32>
    %18 = vector.shape_cast %17 : vector<1x4x32xf32> to vector<4x32xf32>
    %cst_16 = arith.constant dense<0.000000e+00> : vector<2x32xf32>
    %19 = tpu.matmul %16, %4, %cst_16 {dimension_numbers = #tpu.dot_dimension_numbers<[1], [0], [0], [1], [0, 0, 1, 1], [], []>} : vector<2x32xf32>, vector<32x32xf32>, vector<2x32xf32> -> vector<2x32xf32>
    %20 = vector.extract_strided_slice %18 {offsets = [0, 0], sizes = [2, 32], strides = [1, 1]} : vector<4x32xf32> to vector<2x32xf32>
    %21 = arith.mulf %20, %16 : vector<2x32xf32>
    %22 = vector.extract_strided_slice %18 {offsets = [2, 0], sizes = [2, 32], strides = [1, 1]} : vector<4x32xf32> to vector<2x32xf32>
    %23 = arith.mulf %22, %19 : vector<2x32xf32>
    %24 = arith.addf %21, %23 : vector<2x32xf32>
    %c2_17 = arith.constant 2 : index
    %c0_18 = arith.constant 0 : index
    %c0_19 = arith.constant 0 : index
    %25 = vector.load %arg2[%c2_17, %c0_18, %c0_19] : memref<8x4x32xf32, #tpu.memory_space<vmem>>, vector<1x4x32xf32>
    %26 = vector.shape_cast %25 : vector<1x4x32xf32> to vector<4x32xf32>
    %cst_20 = arith.constant dense<0.000000e+00> : vector<2x32xf32>
    %27 = tpu.matmul %24, %6, %cst_20 {dimension_numbers = #tpu.dot_dimension_numbers<[1], [0], [0], [1], [0, 0, 1, 1], [], []>} : vector<2x32xf32>, vector<32x32xf32>, vector<2x32xf32> -> vector<2x32xf32>
    %28 = vector.extract_strided_slice %26 {offsets = [0, 0], sizes = [2, 32], strides = [1, 1]} : vector<4x32xf32> to vector<2x32xf32>
    %29 = arith.mulf %28, %24 : vector<2x32xf32>
    %30 = vector.extract_strided_slice %26 {offsets = [2, 0], sizes = [2, 32], strides = [1, 1]} : vector<4x32xf32> to vector<2x32xf32>
    %31 = arith.mulf %30, %27 : vector<2x32xf32>
    %32 = arith.addf %29, %31 : vector<2x32xf32>
    %c3_21 = arith.constant 3 : index
    %c0_22 = arith.constant 0 : index
    %c0_23 = arith.constant 0 : index
    %33 = vector.load %arg2[%c3_21, %c0_22, %c0_23] : memref<8x4x32xf32, #tpu.memory_space<vmem>>, vector<1x4x32xf32>
    %34 = vector.shape_cast %33 : vector<1x4x32xf32> to vector<4x32xf32>
    %cst_24 = arith.constant dense<0.000000e+00> : vector<2x32xf32>
    %35 = tpu.matmul %32, %8, %cst_24 {dimension_numbers = #tpu.dot_dimension_numbers<[1], [0], [0], [1], [0, 0, 1, 1], [], []>} : vector<2x32xf32>, vector<32x32xf32>, vector<2x32xf32> -> vector<2x32xf32>
    %36 = vector.extract_strided_slice %34 {offsets = [0, 0], sizes = [2, 32], strides = [1, 1]} : vector<4x32xf32> to vector<2x32xf32>
    %37 = arith.mulf %36, %32 : vector<2x32xf32>
    %38 = vector.extract_strided_slice %34 {offsets = [2, 0], sizes = [2, 32], strides = [1, 1]} : vector<4x32xf32> to vector<2x32xf32>
    %39 = arith.mulf %38, %35 : vector<2x32xf32>
    %40 = arith.addf %37, %39 : vector<2x32xf32>
    %c4 = arith.constant 4 : index
    %c0_25 = arith.constant 0 : index
    %c0_26 = arith.constant 0 : index
    %41 = vector.load %arg1[%c4, %c0_25, %c0_26] : memref<7x32x32xf32, #tpu.memory_space<vmem>>, vector<1x32x32xf32>
    %42 = vector.shape_cast %41 : vector<1x32x32xf32> to vector<32x32xf32>
    %cst_27 = arith.constant dense<0.000000e+00> : vector<2x32xf32>
    %43 = tpu.matmul %40, %42, %cst_27 {dimension_numbers = #tpu.dot_dimension_numbers<[1], [0], [0], [1], [0, 0, 1, 1], [], []>} : vector<2x32xf32>, vector<32x32xf32>, vector<2x32xf32> -> vector<2x32xf32>
    %c4_28 = arith.constant 4 : index
    %c0_29 = arith.constant 0 : index
    %c0_30 = arith.constant 0 : index
    %44 = vector.load %arg2[%c4_28, %c0_29, %c0_30] : memref<8x4x32xf32, #tpu.memory_space<vmem>>, vector<1x4x32xf32>
    %45 = vector.shape_cast %44 : vector<1x4x32xf32> to vector<4x32xf32>
    %cst_31 = arith.constant dense<0.000000e+00> : vector<2x32xf32>
    %46 = tpu.matmul %43, %2, %cst_31 {dimension_numbers = #tpu.dot_dimension_numbers<[1], [0], [0], [1], [0, 0, 1, 1], [], []>} : vector<2x32xf32>, vector<32x32xf32>, vector<2x32xf32> -> vector<2x32xf32>
    %47 = vector.extract_strided_slice %45 {offsets = [0, 0], sizes = [2, 32], strides = [1, 1]} : vector<4x32xf32> to vector<2x32xf32>
    %48 = arith.mulf %47, %43 : vector<2x32xf32>
    %49 = vector.extract_strided_slice %45 {offsets = [2, 0], sizes = [2, 32], strides = [1, 1]} : vector<4x32xf32> to vector<2x32xf32>
    %50 = arith.mulf %49, %46 : vector<2x32xf32>
    %51 = arith.addf %48, %50 : vector<2x32xf32>
    %c5 = arith.constant 5 : index
    %c0_32 = arith.constant 0 : index
    %c0_33 = arith.constant 0 : index
    %52 = vector.load %arg2[%c5, %c0_32, %c0_33] : memref<8x4x32xf32, #tpu.memory_space<vmem>>, vector<1x4x32xf32>
    %53 = vector.shape_cast %52 : vector<1x4x32xf32> to vector<4x32xf32>
    %cst_34 = arith.constant dense<0.000000e+00> : vector<2x32xf32>
    %54 = tpu.matmul %51, %4, %cst_34 {dimension_numbers = #tpu.dot_dimension_numbers<[1], [0], [0], [1], [0, 0, 1, 1], [], []>} : vector<2x32xf32>, vector<32x32xf32>, vector<2x32xf32> -> vector<2x32xf32>
    %55 = vector.extract_strided_slice %53 {offsets = [0, 0], sizes = [2, 32], strides = [1, 1]} : vector<4x32xf32> to vector<2x32xf32>
    %56 = arith.mulf %55, %51 : vector<2x32xf32>
    %57 = vector.extract_strided_slice %53 {offsets = [2, 0], sizes = [2, 32], strides = [1, 1]} : vector<4x32xf32> to vector<2x32xf32>
    %58 = arith.mulf %57, %54 : vector<2x32xf32>
    %59 = arith.addf %56, %58 : vector<2x32xf32>
    %c6 = arith.constant 6 : index
    %c0_35 = arith.constant 0 : index
    %c0_36 = arith.constant 0 : index
    %60 = vector.load %arg2[%c6, %c0_35, %c0_36] : memref<8x4x32xf32, #tpu.memory_space<vmem>>, vector<1x4x32xf32>
    %61 = vector.shape_cast %60 : vector<1x4x32xf32> to vector<4x32xf32>
    %cst_37 = arith.constant dense<0.000000e+00> : vector<2x32xf32>
    %62 = tpu.matmul %59, %6, %cst_37 {dimension_numbers = #tpu.dot_dimension_numbers<[1], [0], [0], [1], [0, 0, 1, 1], [], []>} : vector<2x32xf32>, vector<32x32xf32>, vector<2x32xf32> -> vector<2x32xf32>
    %63 = vector.extract_strided_slice %61 {offsets = [0, 0], sizes = [2, 32], strides = [1, 1]} : vector<4x32xf32> to vector<2x32xf32>
    %64 = arith.mulf %63, %59 : vector<2x32xf32>
    %65 = vector.extract_strided_slice %61 {offsets = [2, 0], sizes = [2, 32], strides = [1, 1]} : vector<4x32xf32> to vector<2x32xf32>
    %66 = arith.mulf %65, %62 : vector<2x32xf32>
    %67 = arith.addf %64, %66 : vector<2x32xf32>
    %c7 = arith.constant 7 : index
    %c0_38 = arith.constant 0 : index
    %c0_39 = arith.constant 0 : index
    %68 = vector.load %arg2[%c7, %c0_38, %c0_39] : memref<8x4x32xf32, #tpu.memory_space<vmem>>, vector<1x4x32xf32>
    %69 = vector.shape_cast %68 : vector<1x4x32xf32> to vector<4x32xf32>
    %cst_40 = arith.constant dense<0.000000e+00> : vector<2x32xf32>
    %70 = tpu.matmul %67, %8, %cst_40 {dimension_numbers = #tpu.dot_dimension_numbers<[1], [0], [0], [1], [0, 0, 1, 1], [], []>} : vector<2x32xf32>, vector<32x32xf32>, vector<2x32xf32> -> vector<2x32xf32>
    %71 = vector.extract_strided_slice %69 {offsets = [0, 0], sizes = [2, 32], strides = [1, 1]} : vector<4x32xf32> to vector<2x32xf32>
    %72 = arith.mulf %71, %67 : vector<2x32xf32>
    %73 = vector.extract_strided_slice %69 {offsets = [2, 0], sizes = [2, 32], strides = [1, 1]} : vector<4x32xf32> to vector<2x32xf32>
    %74 = arith.mulf %73, %70 : vector<2x32xf32>
    %75 = arith.addf %72, %74 : vector<2x32xf32>
    %c5_41 = arith.constant 5 : index
    %c0_42 = arith.constant 0 : index
    %c0_43 = arith.constant 0 : index
    %76 = vector.load %arg1[%c5_41, %c0_42, %c0_43] : memref<7x32x32xf32, #tpu.memory_space<vmem>>, vector<1x32x32xf32>
    %77 = vector.shape_cast %76 : vector<1x32x32xf32> to vector<32x32xf32>
    %cst_44 = arith.constant dense<0.000000e+00> : vector<2x32xf32>
    %78 = tpu.matmul %75, %77, %cst_44 {dimension_numbers = #tpu.dot_dimension_numbers<[1], [0], [0], [1], [0, 0, 1, 1], [], []>} : vector<2x32xf32>, vector<32x32xf32>, vector<2x32xf32> -> vector<2x32xf32>
    %79 = arith.mulf %78, %78 : vector<2x32xf32>
    %c6_45 = arith.constant 6 : index
    %c0_46 = arith.constant 0 : index
    %c0_47 = arith.constant 0 : index
    %80 = vector.load %arg1[%c6_45, %c0_46, %c0_47] : memref<7x32x32xf32, #tpu.memory_space<vmem>>, vector<1x32x32xf32>
    %81 = vector.shape_cast %80 : vector<1x32x32xf32> to vector<32x32xf32>
    %cst_48 = arith.constant dense<0.000000e+00> : vector<2x32xf32>
    %82 = tpu.matmul %79, %81, %cst_48 {dimension_numbers = #tpu.dot_dimension_numbers<[1], [0], [0], [1], [0, 0, 1, 1], [], []>} : vector<2x32xf32>, vector<32x32xf32>, vector<2x32xf32> -> vector<2x32xf32>
    %83 = vector.extract_strided_slice %82 {offsets = [0, 0], sizes = [2, 4], strides = [1, 1]} : vector<2x32xf32> to vector<2x4xf32>
    %c0_49 = arith.constant 0 : index
    %c0_50 = arith.constant 0 : index
    %84 = vector.load %arg3[%c0_49, %c0_50] : memref<2x4xf32, #tpu.memory_space<vmem>>, vector<2x4xf32>
    tpu.vector_store %arg3[%c0_49, %c0_50], %83 {strides = array<i32>} : memref<2x4xf32, #tpu.memory_space<vmem>>, vector<2x4xf32>,
    return
  }
}

</mosaic_0001>

<bundles_post_ra>
// kernel: tfq_forward.1
= control target key start
LH: loop header
LB: loop body
LE: loop exit
PB: predicated region body
PF: predicated region fallthrough
CT: control target
= control target key end

     0   :  { %v1270_v3 = vmov 0.0|0.0   ;;  %vm1271_vm0 = vmmov 0   ;;  %v1272_v6 = vmov 0.0   ;;  %s1500_s0 = inlined_call_operand.vmem [shape: f32[2,32], index: 0, kind: input, shape index: {}]   ;;  %s1501_s1 = inlined_call_operand.vmem [shape: f32[7,32,32], index: 1, kind: input, shape index: {}]   ;;  %s1502_s2 = inlined_call_operand.vmem [shape: f32[8,4,32], index: 2, kind: input, shape index: {}]   ;;  %s1503_s3 = inlined_call_operand.hbm [shape: f32[2,4], index: 3, kind: output, shape index: {}]  }
   0x1   :  { %v16_v0 = vld [vmem:[%s1501_s1] sm:$0xff]  ;;  %v17_v1 = vld [vmem:[%s1501_s1 + $0x8] sm:$0xff]  ;;  %v18_v2 = vld [vmem:[%s1501_s1 + $0x10] sm:$0xff]  ;;  %1176 = vmatprep.subr.bf16.mxu0 %v1270_v3  ;;  %1063 = vmatprep.mubr.msk.f32.mxu0 %vm1271_vm0, %v1272_v6 }
   0x2   :  { %v1304_v4 = vpack.c.bf16 %v17_v1, %v16_v0  ;;  %v19_v5 = vld [vmem:[%s1501_s1 + $0x18] sm:$0xff]  ;;  %1182 = vmatprep.subr.bf16.mxu1 %v1270_v3  ;;  %1074 = vmatprep.mubr.msk.f32.mxu1 %vm1271_vm0, %v1272_v6 }
   0x3   :  { %8 = vsyncpa [#allocation3], 0  ;;  %v1315_v7 = vpack.c.bf16 %v19_v5, %v18_v2  ;;  %v15_v8 = vld [vmem:[%s1500_s0] sm:$0x3]  ;;  %vm36_vm1 = vcmask 261120   ;;  %v959_v10 = vld [vmem:[%s1501_s1 + $0x28] sm:$0xff] }
   0x4   :  { %1178 = vmatpush3.bf16.msra.mxu0 %v1304_v4  ;;  %v958_v9 = vld [vmem:[%s1501_s1 + $0x20] sm:$0xff]  ;;  %v960_v12 = vld [vmem:[%s1501_s1 + $0x30] sm:$0xff]  ;;  %v961_v13 = vld [vmem:[%s1501_s1 + $0x38] sm:$0xff]  ;;  %vm942_vm2 = vcmask 25600  }
   0x5   :  { %1179 = vmatprep.subr.bf16.mxu0 %v1270_v3  ;;  %v1332_v11 = vpack.c.bf16 %v959_v10, %v958_v9  ;;  %v1342_v14 = vpack.c.bf16 %v961_v13, %v960_v12  ;;  %v35_v15 = vld [vmem:[%s1502_s2] sm:$0xf]  ;;  %v963_v24 = vld [vmem:[%s1501_s1 + $0x48] sm:$0xff]  ;;  %v964_v26 = vld [vmem:[%s1501_s1 + $0x50] sm:$0xff] }
   0x6   :  { %v110_v19 = vmul.f32 %v35_v15, %v15_v8  ;;  %v962_v23 = vld [vmem:[%s1501_s1 + $0x40] sm:$0xff]  ;;  %v965_v27 = vld [vmem:[%s1501_s1 + $0x58] sm:$0xff]  ;;  %v967_v38 = vld [vmem:[%s1501_s1 + $0x68] sm:$0xff] }
   0x7   :  { %1184 = vmatpush3.bf16.msra.mxu1 %v1332_v11  ;;  %v1358_v25 = vpack.c.bf16 %v963_v24, %v962_v23  ;;  %v1368_v28 = vpack.c.bf16 %v965_v27, %v964_v26  ;;  %v971_v32 = vld [vmem:[%s1502_s2 + $0x4] sm:$0xf]  ;;  %v968_v40 = vld [vmem:[%s1501_s1 + $0x70] sm:$0xff]  ;;  %v969_v41 = vld [vmem:[%s1501_s1 + $0x78] sm:$0xff] }
   0x8   :  { %1181 = vmatpush3.bf16.msra.mxu0 %v1315_v7  ;;  %1185 = vmatprep.subr.bf16.mxu1 %v1270_v3  ;;  %v966_v37 = vld [vmem:[%s1501_s1 + $0x60] sm:$0xff]  ;;  %v1198_v42 = vpack.c.bf16 %v969_v41, %v968_v40  ;;  %v973_v46 = vld [vmem:[%s1502_s2 + $0x8] sm:$0xf]  ;;  %v979_v54 = vld [vmem:[%s1501_s1 + $0x90] sm:$0xff] }
   0x9   :  { %1188 = vmatprep.subr.bf16.mxu0 %v1270_v3  ;;  %v1384_v39 = vpack.c.bf16 %v967_v38, %v966_v37  ;;  %v977_v51 = vld [vmem:[%s1501_s1 + $0x80] sm:$0xff]  ;;  %v978_v52 = vld [vmem:[%s1501_s1 + $0x88] sm:$0xff]  ;;  %v980_v55 = vld [vmem:[%s1501_s1 + $0x98] sm:$0xff] }
   0xa   :  { %v1201_v53 = vpack.c.bf16 %v978_v52, %v977_v51  ;;  %v1204_v56 = vpack.c.bf16 %v980_v55, %v979_v54  ;;  %v975_v60 = vld [vmem:[%s1502_s2 + $0xc] sm:$0xf]  ;;  %v986_v24 = vld [vmem:[%s1502_s2 + $0x18] sm:$0xf]  ;;  %v988_v40 = vld [vmem:[%s1502_s2 + $0x1c] sm:$0xf] }
   0xb   :  { %1064 = vmatmul.mubr.msk.f32.vlgmr.msra.gmra.mrb[0].mxu0 %vm36_vm1, %v15_v8  ;;  %1187 = vmatpush3.bf16.msra.mxu1 %v1342_v14  ;;  %v982_v8 = vld [vmem:[%s1502_s2 + $0x10] sm:$0xf] }
   0xc   :  { %1085 = vmatprep.mubr.msk.f32.mxu0 %vm1271_vm0, %v1272_v6  ;;  %1194 = vmatprep.subr.bf16.mxu1 %v1270_v3 }
   0xd   :  { %1190 = vmatpush3.bf16.msra.mxu0 %v1358_v25 }
   0xe   :  { %1191 = vmatprep.subr.bf16.mxu0 %v1270_v3 }
  0x11   :  { %1193 = vmatpush3.bf16.msra.mxu0 %v1368_v28 }
  0x12   :  { %1200 = vmatprep.subr.bf16.mxu0 %v1270_v3 }
  0xde   :  { %v106_v16 = vpop.f32.mrb[0].mxu0 }
  0xdf   :  { %v112_v17 = vrot.slane %v106_v16, 6  ;;  %v1065_v18 = vpop.f32.mrb[1].mxu0  ;;  %v984_v16 = vld [vmem:[%s1502_s2 + $0x14] sm:$0xf]  ;;  %s1273_s2 = smov [#allocation2]  }
  0xe0   :  { %s950_s29 = sshll.u32 %s1273_s2, 4  ;;  %s951_s29 = int_to_ptr.vmem [resolvable:$true] %s950_s29 }
  0xe1   :  { %v114_v20 = vmul.f32 %v112_v17, %v35_v15  ;;  %s1246_s30 = scalar_lea.vmem %s951_s29, 32  ;;  %p1251_p1 = scmp.lt.s32.totalorder %s951_s29, %s951_s29 }
  0xe2   :  { %p1247_p0 = scmp.ne.s32.totalorder %s951_s29, %s1246_s30  ;;  %p1252_p2 = scmp.lt.s32.totalorder %s1246_s30, %s1246_s30 }
  0xe3   :  { %v116_v21 = vrot.slane %v114_v20, 2 }
  0xe4   :  { %p1253_p3 = por %p1252_p2, %p1251_p1 }
  0xe5   :  { %v118_v22 = vadd.f32 %v116_v21, %v110_v19 }
  0xe6   :  { %p1254_p4 = pnand %p1253_p3, %p1247_p0 }
  0xe7   :  { %1075 = vmatmul.mubr.msk.f32.vlgmr.msra.gmra.mrb[0].mxu1 %vm36_vm1, %v118_v22  ;;  %v194_v34 = vmul.f32 %v971_v32, %v118_v22 }
  0xe8   :  { %1096 = vmatprep.mubr.msk.f32.mxu1 %vm1271_vm0, %v1272_v6  ;;  %1196 = vmatpush3.bf16.msra.mxu1 %v1384_v39 }
  0xe9   :  { %1197 = vmatprep.subr.bf16.mxu1 %v1270_v3 }
  0xec   :  { %1199 = vmatpush3.bf16.msra.mxu1 %v1198_v42 }
  0xed   :  { %1206 = vmatprep.subr.bf16.mxu1 %v1270_v3 }
 0x1ba   :  { %v190_v29 = vpop.f32.mrb[0].mxu1 }
 0x1bb   :  { %v196_v30 = vrot.slane %v190_v29, 6  ;;  %v1076_v31 = vpop.f32.mrb[1].mxu1  ;;  %v990_v29 = vld [vmem:[%s1501_s1 + $0xa0] sm:$0xff] }
 0x1bd   :  { %v198_v33 = vmul.f32 %v971_v32, %v196_v30  ;;  %v991_v30 = vld [vmem:[%s1501_s1 + $0xa8] sm:$0xff]  ;;  %v992_v32 = vld [vmem:[%s1501_s1 + $0xb0] sm:$0xff] }
 0x1be   :  { %v1231_v31 = vpack.c.bf16 %v991_v30, %v990_v29 }
 0x1bf   :  { %v200_v35 = vrot.slane %v198_v33, 2 }
 0x1c1   :  { %v202_v36 = vadd.f32 %v200_v35, %v194_v34  ;;  %v995_v34 = vld [vmem:[%s1501_s1 + $0xc0] sm:$0xff]  ;;  %v996_v35 = vld [vmem:[%s1501_s1 + $0xc8] sm:$0xff] }
 0x1c3   :  { %1086 = vmatmul.mubr.msk.f32.vlgmr.msra.gmra.mrb[2].mxu0 %vm36_vm1, %v202_v36  ;;  %v278_v48 = vmul.f32 %v973_v46, %v202_v36  ;;  %v1237_v36 = vpack.c.bf16 %v996_v35, %v995_v34 }
 0x1c4   :  { %1107 = vmatprep.mubr.msk.f32.mxu0 %vm1271_vm0, %v1272_v6  ;;  %1202 = vmatpush3.bf16.msra.mxu0 %v1201_v53 }
 0x1c5   :  { %1203 = vmatprep.subr.bf16.mxu0 %v1270_v3 }
 0x1c8   :  { %1205 = vmatpush3.bf16.msra.mxu0 %v1204_v56 }
 0x1c9   :  { %1212 = vmatprep.subr.bf16.mxu0 %v1270_v3 }
 0x296   :  { %v274_v43 = vpop.f32.mrb[2].mxu0 }
 0x297   :  { %v280_v44 = vrot.slane %v274_v43, 6  ;;  %v1087_v45 = vpop.f32.mrb[3].mxu0 }
 0x298   :  { %v997_v45 = vld [vmem:[%s1501_s1 + $0xd0] sm:$0xff] }
 0x299   :  { %v282_v47 = vmul.f32 %v973_v46, %v280_v44 }
 0x29b   :  { %v284_v49 = vrot.slane %v282_v47, 2 }
 0x29d   :  { %v286_v50 = vadd.f32 %v284_v49, %v278_v48 }
 0x29f   :  { %1097 = vmatmul.mubr.msk.f32.vlgmr.msra.gmra.mrb[2].mxu1 %vm36_vm1, %v286_v50  ;;  %v362_v62 = vmul.f32 %v975_v60, %v286_v50 }
 0x2a0   :  { %1208 = vmatpush3.bf16.msra.mxu1 %v1304_v4  ;;  %1118 = vmatprep.mubr.msk.f32.mxu1 %vm1271_vm0, %v1272_v6 }
 0x2a1   :  { %1209 = vmatprep.subr.bf16.mxu1 %v1270_v3 }
 0x2a4   :  { %1211 = vmatpush3.bf16.msra.mxu1 %v1315_v7 }
 0x2a5   :  { %1218 = vmatprep.subr.bf16.mxu1 %v1270_v3 }
 0x372   :  { %v358_v57 = vpop.f32.mrb[2].mxu1 }
 0x373   :  { %v364_v58 = vrot.slane %v358_v57, 6  ;;  %v1098_v59 = vpop.f32.mrb[3].mxu1 }
 0x375   :  { %v366_v61 = vmul.f32 %v975_v60, %v364_v58 }
 0x377   :  { %v368_v63 = vrot.slane %v366_v61, 2 }
 0x379   :  { %v370_v0 = vadd.f32 %v368_v63, %v362_v62 }
 0x37b   :  { %1108 = vmatmul.mubr.msk.f32.vlgmr.msra.gmra.mrb[4].mxu0 %vm36_vm1, %v370_v0 }
 0x37c   :  { %1214 = vmatpush3.bf16.msra.mxu0 %v1332_v11  ;;  %1129 = vmatprep.mubr.msk.f32.mxu0 %vm1271_vm0, %v1272_v6 }
 0x37d   :  { %1215 = vmatprep.subr.bf16.mxu0 %v1270_v3 }
 0x380   :  { %1217 = vmatpush3.bf16.msra.mxu0 %v1342_v14 }
 0x381   :  { %1224 = vmatprep.subr.bf16.mxu0 %v1270_v3 }
 0x44e   :  { %v445_v1 = vpop.f32.mrb[4].mxu0 }
 0x44f   :  { %v1109_v2 = vpop.f32.mrb[5].mxu0  ;;  %1119 = vmatmul.mubr.msk.f32.vlgmr.msra.gmra.mrb[4].mxu1 %vm36_vm1, %v445_v1  ;;  %v524_v10 = vmul.f32 %v982_v8, %v445_v1 }
 0x450   :  { %1220 = vmatpush3.bf16.msra.mxu1 %v1358_v25  ;;  %1140 = vmatprep.mubr.msk.f32.mxu1 %vm1271_vm0, %v1272_v6 }
 0x451   :  { %1221 = vmatprep.subr.bf16.mxu1 %v1270_v3 }
 0x454   :  { %1223 = vmatpush3.bf16.msra.mxu1 %v1368_v28 }
 0x455   :  { %1230 = vmatprep.subr.bf16.mxu1 %v1270_v3 }
 0x522   :  { %v520_v4 = vpop.f32.mrb[4].mxu1 }
 0x523   :  { %v526_v5 = vrot.slane %v520_v4, 6  ;;  %v1120_v7 = vpop.f32.mrb[5].mxu1 }
 0x525   :  { %v528_v9 = vmul.f32 %v982_v8, %v526_v5 }
 0x527   :  { %v530_v11 = vrot.slane %v528_v9, 2 }
 0x529   :  { %v532_v12 = vadd.f32 %v530_v11, %v524_v10 }
 0x52b   :  { %1130 = vmatmul.mubr.msk.f32.vlgmr.msra.gmra.mrb[6].mxu0 %vm36_vm1, %v532_v12  ;;  %v608_v18 = vmul.f32 %v984_v16, %v532_v12 }
 0x52c   :  { %1226 = vmatpush3.bf16.msra.mxu0 %v1384_v39  ;;  %1151 = vmatprep.mubr.msk.f32.mxu0 %vm1271_vm0, %v1272_v6 }
 0x52d   :  { %1227 = vmatprep.subr.bf16.mxu0 %v1270_v3 }
 0x530   :  { %1229 = vmatpush3.bf16.msra.mxu0 %v1198_v42 }
 0x531   :  { %1236 = vmatprep.subr.bf16.mxu0 %v1270_v3 }
 0x5fe   :  { %v604_v13 = vpop.f32.mrb[6].mxu0 }
 0x5ff   :  { %v610_v14 = vrot.slane %v604_v13, 6  ;;  %v1131_v15 = vpop.f32.mrb[7].mxu0 }
 0x601   :  { %v612_v17 = vmul.f32 %v984_v16, %v610_v14 }
 0x603   :  { %v614_v19 = vrot.slane %v612_v17, 2 }
 0x605   :  { %v616_v20 = vadd.f32 %v614_v19, %v608_v18 }
 0x607   :  { %1141 = vmatmul.mubr.msk.f32.vlgmr.msra.gmra.mrb[6].mxu1 %vm36_vm1, %v616_v20  ;;  %v692_v26 = vmul.f32 %v986_v24, %v616_v20 }
 0x608   :  { %1162 = vmatprep.mubr.msk.f32.mxu1 %vm1271_vm0, %v1272_v6  ;;  %1232 = vmatpush3.bf16.msra.mxu1 %v1231_v31 }
 0x609   :  { %1233 = vmatprep.subr.bf16.mxu1 %v1270_v3 }
 0x6da   :  { %v688_v21 = vpop.f32.mrb[6].mxu1 }
 0x6db   :  { %v694_v22 = vrot.slane %v688_v21, 6  ;;  %v1142_v23 = vpop.f32.mrb[7].mxu1 }
 0x6dd   :  { %v696_v25 = vmul.f32 %v986_v24, %v694_v22 }
 0x6df   :  { %v698_v27 = vrot.slane %v696_v25, 2 }
 0x6e1   :  { %v700_v28 = vadd.f32 %v698_v27, %v692_v26 }
 0x6e3   :  { %1152 = vmatmul.mubr.msk.f32.vlgmr.msra.gmra.mrb[8].mxu0 %vm36_vm1, %v700_v28  ;;  %v776_v42 = vmul.f32 %v988_v40, %v700_v28 }
 0x6e4   :  { %1173 = vmatprep.mubr.msk.f32.mxu0 %vm1271_vm0, %v1272_v6  ;;  %v993_v6 = vld [vmem:[%s1501_s1 + $0xb8] sm:$0xff]  ;;  %1238 = vmatpush3.bf16.msra.mxu0 %v1237_v36 }
 0x6e5   :  { %v1234_v33 = vpack.c.bf16 %v993_v6, %v992_v32  ;;  %1239 = vmatprep.subr.bf16.mxu0 %v1270_v3  ;;  %v998_v3 = vld [vmem:[%s1501_s1 + $0xd8] sm:$0xff] }
 0x6e6   :  { %v1240_v46 = vpack.c.bf16 %v998_v3, %v997_v45 }
 0x6e7   :  { %1235 = vmatpush3.bf16.msra.mxu1 %v1234_v33 }
 0x6e8   :  { %1241 = vmatpush3.bf16.msra.mxu0 %v1240_v46 }
 0x7b6   :  { %v772_v37 = vpop.f32.mrb[8].mxu0 }
 0x7b7   :  { %v778_v38 = vrot.slane %v772_v37, 6  ;;  %v1153_v39 = vpop.f32.mrb[9].mxu0 }
 0x7b9   :  { %v780_v41 = vmul.f32 %v988_v40, %v778_v38 }
 0x7bb   :  { %v782_v43 = vrot.slane %v780_v41, 2 }
 0x7bd   :  { %v784_v44 = vadd.f32 %v782_v43, %v776_v42 }
 0x7bf   :  { %1163 = vmatmul.mubr.msk.f32.vlgmr.msra.gmra.mrb[8].mxu1 %vm36_vm1, %v784_v44 }
 0x892   :  { %v859_v47 = vpop.f32.mrb[8].mxu1 }
 0x893   :  { %v863_v48 = vmul.f32 %v859_v47, %v859_v47  ;;  %v1164_v49 = vpop.f32.mrb[9].mxu1 }
 0x895   :  { %1174 = vmatmul.mubr.msk.f32.vlgmr.msra.gmra.mrb[10].mxu0 %vm36_vm1, %v863_v48 }
 0x968   :  { %v938_v50 = vpop.f32.mrb[10].mxu0 }
 0x969   :  { %943 = vst.msk [vmem:[#allocation2] sm:$0x3] %vm942_vm2, %v938_v50  ;;  %v1175_v51 = vpop.f32.mrb[11].mxu0 }
 0x96a   :  { %1257 = shalt.err (!%p1254_p4)
}
 0x96b   :  { %s1258_s5 = scalar_lea.hbm %s1503_s3, 32 }
 0x96c   :  { %p1259_p5 = scmp.ne.s32.totalorder %s1503_s3, %s1258_s5  ;;  %p1262_p6 = scmp.lt.u32.totalorder %s1258_s5, %s1503_s3 }
 0x96e   :  { %p1264_p7 = pnand %p1262_p6, %p1259_p5 }
 0x970   :  { %1267 = shalt.err (!%p1264_p7)
}
 0x971   :  { %953 = dma.vmem_to_hbm [thread:$0]  %s951_s29, 32, %s1503_s3, [#allocation3]  }
 0x972   :  { %1268 = dma.done.wait [#allocation3], 32  }
 0x973   :  { %1269 = vsyncadd [#allocation3], 4294967264 }
 0x974   :  { %957 = vsyncpa [#allocation3], 1 }

</bundles_post_ra>
